<compile_context>
chip_gen: v7x
topology: tpu7x:2x2x1
jax: 0.10.0
libtpu: 0.0.40
codegen_flags: <defaults>
</compile_context>

<pallas_src>
import jax
import jax.numpy as jnp
from jax import lax
from jax.experimental import pallas as pl
from jax.experimental.pallas import tpu as pltpu

EPS = 1e-5                    # nn.BatchNorm2d default eps
MXU_DTYPE = jnp.bfloat16      # matmul operand dtype (accumulation stays f32)


# --------------------------- wrapper-side helpers --------------------------- #
def _banded_weights(w_oihw, W):
    """PyTorch conv weight (Cout, Cin, 3, 3) -> (3*W*Cin, W*Cout) K-stacked bands.

    Row index (kh*W + w_in)*Cin + ci, column index w_out*Cout + co holds
    w[co, ci, kh, w_in - w_out + 1] (zero when |w_in - w_out| > 1).  This folds
    the kw taps, the width-wise 'same' zero padding AND the 3 kh row taps into a
    single matmul (the LHS concatenates the r-1 / r / r+1 row views along K).
    """
    wk = jnp.transpose(w_oihw, (2, 3, 1, 0)).astype(jnp.float32)   # (kh, kw, ci, co)
    Cin, Cout = wk.shape[2], wk.shape[3]
    w_in = jnp.arange(W)[None, :, None]
    w_out = jnp.arange(W)[None, None, :]
    kw = jnp.arange(3)[:, None, None]
    sel = (w_in == w_out + kw - 1).astype(jnp.float32)             # (3, W, W)
    wb = jnp.einsum("hkic,kab->haibc", wk, sel)                    # (3, W, Cin, W, Cout)
    return wb.reshape(3 * W * Cin, W * Cout)


# --------------------------------- kernel ----------------------------------- #
def _make_kernel(R, inv_count):
    def kernel(x1_ref, w1_ref, b1_ref, g1_ref, be1_ref,
               w2_ref, b2_ref, g2_ref, be2_ref,
               gmat_ref, mask_ref, o_ref):
        mask = mask_ref[...]          # (R, L) f32, 1.0 on real output rows (pre-broadcast)
        gmat = gmat_ref[...]          # (L, L) f32: per-channel fold over W lane-replicas

        def bn_relu(y, g_lane, be_lane):
            # train-mode batch stats over the masked (real) rows, f32 throughout.
            # NOTE: single-pass var = E[x^2]-E[x]^2; fine for this block's activation
            # scale, switch to the two-pass form if |mean| >> std in production.
            yv = y * mask                                          # full-vreg VPU mul
            s = jnp.sum(yv, axis=0, keepdims=True)                 # (1, L)
            ss = jnp.sum(yv * yv, axis=0, keepdims=True)           # (1, L)
            st = jnp.concatenate([s, ss], axis=0)                  # (2, L)
            fold = jnp.dot(st, gmat,
                           preferred_element_type=jnp.float32) * inv_count
            mean, ex2 = fold[0:1, :], fold[1:2, :]
            var = ex2 - mean * mean
            scale = g_lane * lax.rsqrt(var + EPS)
            shift = be_lane - mean * scale
            return jnp.maximum(y * scale + shift, 0.0)

        # ---- conv1: single K-concatenated matmul (K = 3*W*Cin, im2row built in wrapper)
        y1 = jnp.dot(x1_ref[...], w1_ref[...],
                     preferred_element_type=jnp.float32) + b1_ref[...]
        a1 = bn_relu(y1, g1_ref[...], be1_ref[...]) * mask         # pad rows exactly 0

        # ---- conv2: in-kernel im2row via XLU sublane rotations.
        # Wrap-around rows of the rotation land on pad rows (zero, and masked), so
        # the circular roll is exact for every real output row.
        dn = pltpu.roll(a1, 1, axis=0)          # row r <- a1[r-1]
        up = pltpu.roll(a1, R - 1, axis=0)      # row r <- a1[r+1]
        lhs2 = jnp.concatenate([dn, a1, up], axis=1).astype(MXU_DTYPE)   # (R, 3L)
        y2 = jnp.dot(lhs2, w2_ref[...],
                     preferred_element_type=jnp.float32) + b2_ref[...]
        o_ref[...] = bn_relu(y2, g2_ref[...], be2_ref[...])        # lane-dense store

    return kernel


# -------------------------------- wrapper ----------------------------------- #
@jax.jit
def double_conv(x_nchw, params):
    w1, b1, g1, be1, w2, b2, g2, be2 = params
    N, Cin, H, W = x_nchw.shape
    Cout = w1.shape[0]
    Hp = H + 2                     # per-image rows incl. 1 zero row above/below
    R0 = N * Hp
    R = ((R0 + 15) // 16) * 16     # multiple of 16: bf16 sublane packing, aligned M
    L_in, L_out = W * Cin, W * Cout

    # layout glue (plain XLA, fused): NCHW -> zero-H-padded row frame (R, W*Cin)
    xf = jnp.transpose(x_nchw, (0, 2, 3, 1)).astype(jnp.float32)     # NHWC
    xf = jnp.pad(xf, ((0, 0), (1, 1), (0, 0), (0, 0)))               # per-image H pad
    xf = xf.reshape(R0, L_in)
    xf = jnp.pad(xf, ((0, R - R0), (0, 0)))                          # trailing pad rows

    # conv1 im2row LHS built wrapper-side: (R, 3*W*Cin) = [row r-1 | row r | row r+1]
    zrow = jnp.zeros((1, L_in), jnp.float32)
    dn = jnp.concatenate([zrow, xf[:-1]], axis=0)
    up = jnp.concatenate([xf[1:], zrow], axis=0)
    lhs1 = jnp.concatenate([dn, xf, up], axis=1).astype(MXU_DTYPE)

    # K-stacked banded weights: one MXU matmul per conv
    w1s = _banded_weights(w1, W).astype(MXU_DTYPE)    # (3*W*Cin,  W*Cout)
    w2s = _banded_weights(w2, W).astype(MXU_DTYPE)    # (3*W*Cout, W*Cout)

    # per-channel vectors pre-tiled to lanes once (hoisted broadcasts)
    lane = lambda v: jnp.tile(v.astype(jnp.float32).reshape(1, -1), (1, W))
    b1l, g1l, be1l = lane(b1), lane(g1), lane(be1)
    b2l, g2l, be2l = lane(b2), lane(g2), lane(be2)

    # per-channel reduce over the W lane-replicas + broadcast back, as one matmul
    gmat = jnp.kron(jnp.ones((W, W), jnp.float32),
                    jnp.eye(Cout, dtype=jnp.float32))               # (W*Cout, W*Cout)

    # mask of real rows, pre-broadcast to full lane width (no in-kernel broadcasts)
    rows = jnp.arange(R)
    real = (rows < R0) & (rows % Hp >= 1) & (rows % Hp <= H)
    mask_f = jnp.tile(real.astype(jnp.float32).reshape(R, 1), (1, L_out))

    kernel = _make_kernel(R, 1.0 / float(N * H * W))
    vmem = pl.BlockSpec(memory_space=pltpu.MemorySpace.VMEM)
    args = (lhs1, w1s, b1l, g1l, be1l, w2s, b2l, g2l, be2l, gmat, mask_f)

    out = pl.pallas_call(
        kernel,
        out_shape=jax.ShapeDtypeStruct((R, L_out), jnp.float32),
        in_specs=[vmem] * len(args),
        out_specs=vmem,
        compiler_params=pltpu.CompilerParams(vmem_limit_bytes=32 * 1024 * 1024),
    )(*args)

    # output is emitted in the same R-row frame: slice real rows, restore NCHW
    out = out[:R0].reshape(N, Hp, W, Cout)[:, 1:H + 1]
    return jnp.transpose(out, (0, 3, 1, 2))


# ------------------------- pure-JAX reference (check) ------------------------ #
def _ref_double_conv(x_nchw, params):
    w1, b1, g1, be1, w2, b2, g2, be2 = params

    def conv(x, w, b):
        y = lax.conv_general_dilated(
            x, w, window_strides=(1, 1), padding=((1, 1), (1, 1)),
            dimension_numbers=("NCHW", "OIHW", "NCHW"))
        return y + b.reshape(1, -1, 1, 1)

    def bn_relu(y, g, be):
        mean = jnp.mean(y, axis=(0, 2, 3), keepdims=True)
        var = jnp.mean(jnp.square(y - mean), axis=(0, 2, 3), keepdims=True)
        y_hat = (y - mean) / jnp.sqrt(var + EPS)
        return jnp.maximum(y_hat * g.reshape(1, -1, 1, 1)
                           + be.reshape(1, -1, 1, 1), 0.0)

    y = bn_relu(conv(x_nchw, w1, b1), g1, be1)
    return bn_relu(conv(y, w2, b2), g2, be2)


# ---------------------------------- main ------------------------------------- #
if __name__ == "__main__":
    N, Cin, Cout, H, W = 2, 4, 8, 16, 16

    key = jax.random.PRNGKey(0)
    kx, k0, k1, k2, k3, k4, k5, k6, k7 = jax.random.split(key, 9)

    x = jax.random.normal(kx, (N, Cin, H, W), jnp.float32)

    # PyTorch-shaped synthetic parameters (conv OIHW, BN per-channel)
    w1 = jax.random.normal(k0, (Cout, Cin, 3, 3), jnp.float32) / jnp.sqrt(9.0 * Cin)
    b1 = 0.1 * jax.random.normal(k1, (Cout,), jnp.float32)
    g1 = 1.0 + 0.1 * jax.random.normal(k2, (Cout,), jnp.float32)
    be1 = 0.1 * jax.random.normal(k3, (Cout,), jnp.float32)
    w2 = jax.random.normal(k4, (Cout, Cout, 3, 3), jnp.float32) / jnp.sqrt(9.0 * Cout)
    b2 = 0.1 * jax.random.normal(k5, (Cout,), jnp.float32)
    g2 = 1.0 + 0.1 * jax.random.normal(k6, (Cout,), jnp.float32)
    be2 = 0.1 * jax.random.normal(k7, (Cout,), jnp.float32)

    params = (w1, b1, g1, be1, w2, b2, g2, be2)

    out = jax.block_until_ready(double_conv(x, params))
    ref = jax.block_until_ready(_ref_double_conv(x, params))

    assert out.shape == (N, Cout, H, W), out.shape
    # tolerance sized for bf16 MXU operands through two conv layers
    # (f32 accumulation, f32 BN math); reference is pure f32.
    assert jnp.allclose(out, ref, atol=2e-2, rtol=2e-2), \
        float(jnp.max(jnp.abs(out - ref)))
    print("KERNEL_OK")
</pallas_src>

<mosaic_0001>
module attributes {stable_mosaic.version = 11 : i64} {
  func.func @kernel(%arg0: memref<48x192xbf16, #tpu.memory_space<vmem>>, %arg1: memref<192x128xbf16, #tpu.memory_space<vmem>>, %arg2: memref<1x128xf32, #tpu.memory_space<vmem>>, %arg3: memref<1x128xf32, #tpu.memory_space<vmem>>, %arg4: memref<1x128xf32, #tpu.memory_space<vmem>>, %arg5: memref<384x128xbf16, #tpu.memory_space<vmem>>, %arg6: memref<1x128xf32, #tpu.memory_space<vmem>>, %arg7: memref<1x128xf32, #tpu.memory_space<vmem>>, %arg8: memref<1x128xf32, #tpu.memory_space<vmem>>, %arg9: memref<128x128xf32, #tpu.memory_space<vmem>>, %arg10: memref<48x128xf32, #tpu.memory_space<vmem>>, %arg11: memref<48x128xf32, #tpu.memory_space<vmem>>) attributes {dimension_semantics = [], scalar_prefetch = 0 : i64, scratch_operands = 0 : i64, tpu.core_type = #tpu.core_type<tc>} {
    %c0 = arith.constant 0 : index
    %c0_0 = arith.constant 0 : index
    %0 = vector.load %arg10[%c0, %c0_0] : memref<48x128xf32, #tpu.memory_space<vmem>>, vector<48x128xf32>
    %c0_1 = arith.constant 0 : index
    %c0_2 = arith.constant 0 : index
    %1 = vector.load %arg9[%c0_1, %c0_2] : memref<128x128xf32, #tpu.memory_space<vmem>>, vector<128x128xf32>
    %c0_3 = arith.constant 0 : index
    %c0_4 = arith.constant 0 : index
    %2 = vector.load %arg0[%c0_3, %c0_4] : memref<48x192xbf16, #tpu.memory_space<vmem>>, vector<48x192xbf16>
    %c0_5 = arith.constant 0 : index
    %c0_6 = arith.constant 0 : index
    %3 = vector.load %arg1[%c0_5, %c0_6] : memref<192x128xbf16, #tpu.memory_space<vmem>>, vector<192x128xbf16>
    %cst = arith.constant dense<0.000000e+00> : vector<48x128xf32>
    %4 = tpu.matmul %2, %3, %cst {dimension_numbers = #tpu.dot_dimension_numbers<[1], [0], [0], [1], [0, 0, 1, 1], [], []>} : vector<48x192xbf16>, vector<192x128xbf16>, vector<48x128xf32> -> vector<48x128xf32>
    %c0_7 = arith.constant 0 : index
    %c0_8 = arith.constant 0 : index
    %5 = vector.load %arg2[%c0_7, %c0_8] : memref<1x128xf32, #tpu.memory_space<vmem>>, vector<1x128xf32>
    %6 = vector.broadcast %5 : vector<1x128xf32> to vector<48x128xf32>
    %7 = arith.addf %4, %6 : vector<48x128xf32>
    %c0_9 = arith.constant 0 : index
    %c0_10 = arith.constant 0 : index
    %8 = vector.load %arg3[%c0_9, %c0_10] : memref<1x128xf32, #tpu.memory_space<vmem>>, vector<1x128xf32>
    %c0_11 = arith.constant 0 : index
    %c0_12 = arith.constant 0 : index
    %9 = vector.load %arg4[%c0_11, %c0_12] : memref<1x128xf32, #tpu.memory_space<vmem>>, vector<1x128xf32>
    %10 = arith.mulf %7, %0 : vector<48x128xf32>
    %cst_13 = arith.constant dense<0.000000e+00> : vector<128xf32>
    %11 = vector.multi_reduction <add>, %10, %cst_13 [0] : vector<48x128xf32> to vector<128xf32>
    %12 = vector.shape_cast %11 : vector<128xf32> to vector<1x128xf32>
    %13 = arith.mulf %10, %10 : vector<48x128xf32>
    %cst_14 = arith.constant dense<0.000000e+00> : vector<128xf32>
    %14 = vector.multi_reduction <add>, %13, %cst_14 [0] : vector<48x128xf32> to vector<128xf32>
    %15 = vector.shape_cast %14 : vector<128xf32> to vector<1x128xf32>
    %16 = tpu.concatenate %12, %15 in 0 : vector<1x128xf32>, vector<1x128xf32> -> vector<2x128xf32>
    %cst_15 = arith.constant dense<0.000000e+00> : vector<2x128xf32>
    %17 = tpu.matmul %16, %1, %cst_15 {dimension_numbers = #tpu.dot_dimension_numbers<[1], [0], [0], [1], [0, 0, 1, 1], [], []>} : vector<2x128xf32>, vector<128x128xf32>, vector<2x128xf32> -> vector<2x128xf32>
    %cst_16 = arith.constant 0.001953125 : f32
    %18 = vector.broadcast %cst_16 : f32 to vector<2x128xf32>
    %19 = arith.mulf %17, %18 : vector<2x128xf32>
    %20 = vector.extract_strided_slice %19 {offsets = [0, 0], sizes = [1, 128], strides = [1, 1]} : vector<2x128xf32> to vector<1x128xf32>
    %21 = vector.extract_strided_slice %19 {offsets = [1, 0], sizes = [1, 128], strides = [1, 1]} : vector<2x128xf32> to vector<1x128xf32>
    %22 = arith.mulf %20, %20 : vector<1x128xf32>
    %23 = arith.subf %21, %22 : vector<1x128xf32>
    %cst_17 = arith.constant 9.99999974E-6 : f32
    %24 = vector.broadcast %cst_17 : f32 to vector<1x128xf32>
    %25 = arith.addf %23, %24 : vector<1x128xf32>
    %26 = math.rsqrt %25 : vector<1x128xf32>
    %27 = arith.mulf %8, %26 : vector<1x128xf32>
    %28 = arith.mulf %20, %27 : vector<1x128xf32>
    %29 = arith.subf %9, %28 : vector<1x128xf32>
    %30 = vector.broadcast %27 : vector<1x128xf32> to vector<48x128xf32>
    %31 = arith.mulf %7, %30 : vector<48x128xf32>
    %32 = vector.broadcast %29 : vector<1x128xf32> to vector<48x128xf32>
    %33 = arith.addf %31, %32 : vector<48x128xf32>
    %cst_18 = arith.constant 0.000000e+00 : f32
    %34 = vector.broadcast %cst_18 : f32 to vector<48x128xf32>
    %35 = arith.maximumf %33, %34 : vector<48x128xf32>
    %36 = arith.mulf %35, %0 : vector<48x128xf32>
    %c1_i32 = arith.constant 1 : i32
    %37 = tpu.dynamic_rotate %36 by %c1_i32 dim 0 : vector<48x128xf32>, i32 -> vector<48x128xf32>
    %c47_i32 = arith.constant 47 : i32
    %38 = tpu.dynamic_rotate %36 by %c47_i32 dim 0 : vector<48x128xf32>, i32 -> vector<48x128xf32>
    %39 = tpu.concatenate %37, %36, %38 in 1 : vector<48x128xf32>, vector<48x128xf32>, vector<48x128xf32> -> vector<48x384xf32>
    %40 = arith.truncf %39 : vector<48x384xf32> to vector<48x384xbf16>
    %c0_19 = arith.constant 0 : index
    %c0_20 = arith.constant 0 : index
    %41 = vector.load %arg5[%c0_19, %c0_20] : memref<384x128xbf16, #tpu.memory_space<vmem>>, vector<384x128xbf16>
    %cst_21 = arith.constant dense<0.000000e+00> : vector<48x128xf32>
    %42 = tpu.matmul %40, %41, %cst_21 {dimension_numbers = #tpu.dot_dimension_numbers<[1], [0], [0], [1], [0, 0, 1, 1], [], []>} : vector<48x384xbf16>, vector<384x128xbf16>, vector<48x128xf32> -> vector<48x128xf32>
    %c0_22 = arith.constant 0 : index
    %c0_23 = arith.constant 0 : index
    %43 = vector.load %arg6[%c0_22, %c0_23] : memref<1x128xf32, #tpu.memory_space<vmem>>, vector<1x128xf32>
    %44 = vector.broadcast %43 : vector<1x128xf32> to vector<48x128xf32>
    %45 = arith.addf %42, %44 : vector<48x128xf32>
    %c0_24 = arith.constant 0 : index
    %c0_25 = arith.constant 0 : index
    %46 = vector.load %arg7[%c0_24, %c0_25] : memref<1x128xf32, #tpu.memory_space<vmem>>, vector<1x128xf32>
    %c0_26 = arith.constant 0 : index
    %c0_27 = arith.constant 0 : index
    %47 = vector.load %arg8[%c0_26, %c0_27] : memref<1x128xf32, #tpu.memory_space<vmem>>, vector<1x128xf32>
    %48 = arith.mulf %45, %0 : vector<48x128xf32>
    %cst_28 = arith.constant dense<0.000000e+00> : vector<128xf32>
    %49 = vector.multi_reduction <add>, %48, %cst_28 [0] : vector<48x128xf32> to vector<128xf32>
    %50 = vector.shape_cast %49 : vector<128xf32> to vector<1x128xf32>
    %51 = arith.mulf %48, %48 : vector<48x128xf32>
    %cst_29 = arith.constant dense<0.000000e+00> : vector<128xf32>
    %52 = vector.multi_reduction <add>, %51, %cst_29 [0] : vector<48x128xf32> to vector<128xf32>
    %53 = vector.shape_cast %52 : vector<128xf32> to vector<1x128xf32>
    %54 = tpu.concatenate %50, %53 in 0 : vector<1x128xf32>, vector<1x128xf32> -> vector<2x128xf32>
    %cst_30 = arith.constant dense<0.000000e+00> : vector<2x128xf32>
    %55 = tpu.matmul %54, %1, %cst_30 {dimension_numbers = #tpu.dot_dimension_numbers<[1], [0], [0], [1], [0, 0, 1, 1], [], []>} : vector<2x128xf32>, vector<128x128xf32>, vector<2x128xf32> -> vector<2x128xf32>
    %cst_31 = arith.constant 0.001953125 : f32
    %56 = vector.broadcast %cst_31 : f32 to vector<2x128xf32>
    %57 = arith.mulf %55, %56 : vector<2x128xf32>
    %58 = vector.extract_strided_slice %57 {offsets = [0, 0], sizes = [1, 128], strides = [1, 1]} : vector<2x128xf32> to vector<1x128xf32>
    %59 = vector.extract_strided_slice %57 {offsets = [1, 0], sizes = [1, 128], strides = [1, 1]} : vector<2x128xf32> to vector<1x128xf32>
    %60 = arith.mulf %58, %58 : vector<1x128xf32>
    %61 = arith.subf %59, %60 : vector<1x128xf32>
    %cst_32 = arith.constant 9.99999974E-6 : f32
    %62 = vector.broadcast %cst_32 : f32 to vector<1x128xf32>
    %63 = arith.addf %61, %62 : vector<1x128xf32>
    %64 = math.rsqrt %63 : vector<1x128xf32>
    %65 = arith.mulf %46, %64 : vector<1x128xf32>
    %66 = arith.mulf %58, %65 : vector<1x128xf32>
    %67 = arith.subf %47, %66 : vector<1x128xf32>
    %68 = vector.broadcast %65 : vector<1x128xf32> to vector<48x128xf32>
    %69 = arith.mulf %45, %68 : vector<48x128xf32>
    %70 = vector.broadcast %67 : vector<1x128xf32> to vector<48x128xf32>
    %71 = arith.addf %69, %70 : vector<48x128xf32>
    %cst_33 = arith.constant 0.000000e+00 : f32
    %72 = vector.broadcast %cst_33 : f32 to vector<48x128xf32>
    %73 = arith.maximumf %71, %72 : vector<48x128xf32>
    %c0_34 = arith.constant 0 : index
    %c0_35 = arith.constant 0 : index
    %74 = vector.load %arg11[%c0_34, %c0_35] : memref<48x128xf32, #tpu.memory_space<vmem>>, vector<48x128xf32>
    tpu.vector_store %arg11[%c0_34, %c0_35], %73 {strides = array<i32>} : memref<48x128xf32, #tpu.memory_space<vmem>>, vector<48x128xf32>,
    return
  }
}

</mosaic_0001>

<bundles_post_ra>
// kernel: double_conv.1
= control target key start
LH: loop header
LB: loop body
LE: loop exit
PB: predicated region body
PF: predicated region fallthrough
CT: control target
= control target key end

     0   :  { %v1287_v0 = vmov 0   ;;  %vm197_vm0 = vcmask 523264   ;;  %v1288_v22 = vmov 0.0|0.0   ;;  %vm1289_vm1 = vmmov 0   ;;  %s1763_s1 = inlined_call_operand.vmem [shape: bf16[192,128], index: 1, kind: input, shape index: {}]   ;;  %s1764_s0 = inlined_call_operand.vmem [shape: bf16[48,192], index: 0, kind: input, shape index: {}]   ;;  %s1765_s9 = inlined_call_operand.vmem [shape: f32[128,128], index: 9, kind: input, shape index: {}]   ;;  %s1766_s2 = inlined_call_operand.vmem [shape: f32[1,128], index: 2, kind: input, shape index: {}]   ;;  %s1767_s10 = inlined_call_operand.vmem [shape: f32[48,128], index: 10, kind: input, shape index: {}]   ;;  %s1768_s5 = inlined_call_operand.vmem [shape: bf16[384,128], index: 5, kind: input, shape index: {}]   ;;  %s1769_s3 = inlined_call_operand.vmem [shape: f32[1,128], index: 3, kind: input, shape index: {}]   ;;  %s1770_s4 = inlined_call_operand.vmem [shape: f32[1,128], index: 4, kind: input, shape index: {}]   ;;  %s1771_s6 = inlined_call_operand.vmem [shape: f32[1,128], index: 6, kind: input, shape index: {}]   ;;  %s1772_s7 = inlined_call_operand.vmem [shape: f32[1,128], index: 7, kind: input, shape index: {}]   ;;  %s1773_s8 = inlined_call_operand.vmem [shape: f32[1,128], index: 8, kind: input, shape index: {}]   ;;  %s1774_s11 = inlined_call_operand.vmem [shape: f32[48,128], index: 11, kind: output, shape index: {}]  }
   0x1   :  { %207 = vmatprep.subr.bf16.mxu0 %v1287_v0  ;;  %v1238_v1 = vld [vmem:[%s1763_s1] sm:$0xff]   ;;  %v1239_v2 = vld [vmem:[%s1763_s1 + $0x8] sm:$0xff]   ;;  %v1240_v3 = vld [vmem:[%s1763_s1 + $0x10] sm:$0xff]   ;;  %1185 = vmatprep.subr.bf16.mxu1 %v1288_v22  ;;  %v1290_v43 = vmov 0.0   ;;  %vm300_vm2 = vcmask 1040384  }
   0x2   :  { %208 = vmatpush1.bf16.msra.mxu0 %v1238_v1  ;;  %v1241_v4 = vld [vmem:[%s1763_s1 + $0x18] sm:$0xff]   ;;  %v1252_v5 = vld [vmem:[%s1764_s0 + $0x4] ss:$8 sps:$4 sm:$0xff]   ;;  %v1244_v8 = vld [vmem:[%s1763_s1 + $0x30] sm:$0xff]   ;;  %1119 = vmatprep.mubr.msk.f32.mxu1 %vm1289_vm1, %v1290_v43 }
   0x3   :  { %209 = vmatprep.subr.bf16.mxu0 %v1287_v0  ;;  %v1242_v6 = vld [vmem:[%s1763_s1 + $0x20] sm:$0xff]   ;;  %980 = vmatprep.mubr.msk.bf16.mxu0 %vm197_vm0, %v1252_v5  ;;  %v1243_v7 = vld [vmem:[%s1763_s1 + $0x28] sm:$0xff]   ;;  %v1245_v9 = vld [vmem:[%s1763_s1 + $0x38] sm:$0xff]  }
   0x4   :  { %v1246_v10 = vld [vmem:[%s1763_s1 + $0x40] sm:$0xff]   ;;  %v1247_v11 = vld [vmem:[%s1763_s1 + $0x48] sm:$0xff]   ;;  %v1248_v12 = vld [vmem:[%s1763_s1 + $0x50] sm:$0xff]  }
   0x5   :  { %v1249_v13 = vld [vmem:[%s1763_s1 + $0x58] sm:$0xff]   ;;  %v1250_v14 = vld [vmem:[%s1764_s0] ss:$8 sps:$4 sm:$0xff]   ;;  %v1256_v17 = vld [vmem:[%s1764_s0 + $0x24] ss:$8 sps:$4 sm:$0xff]  }
   0x6   :  { %210 = vmatpush1.bf16.msra.mxu0 %v1239_v2  ;;  %v1253_v15 = vld [vmem:[%s1764_s0 + $0x14] ss:$8 sps:$4 sm:$0xff]   ;;  %v1255_v16 = vld [vmem:[%s1764_s0 + $0x10] ss:$8 sps:$4 sm:$0xff]   ;;  %v1258_v18 = vld [vmem:[%s1764_s0 + $0x20] ss:$8 sps:$4 sm:$0xff]  }
   0x7   :  { %211 = vmatprep.subr.bf16.mxu0 %v1287_v0  ;;  %v45_v19 = vld [vmem:[%s1765_s9] sm:$0xff]  ;;  %v46_v20 = vld [vmem:[%s1765_s9 + $0x8] sm:$0xff]  ;;  %v47_v23 = vld [vmem:[%s1765_s9 + $0x10] sm:$0xff] }
   0x8   :  { %v1415_v21 = vpack.c.bf16 %v46_v20, %v45_v19  ;;  %v48_v24 = vld [vmem:[%s1765_s9 + $0x18] sm:$0xff]  ;;  %v49_v26 = vld [vmem:[%s1765_s9 + $0x20] sm:$0xff]  ;;  %v50_v27 = vld [vmem:[%s1765_s9 + $0x28] sm:$0xff] }
   0x9   :  { %v1426_v25 = vpack.c.bf16 %v48_v24, %v47_v23  ;;  %v1436_v28 = vpack.c.bf16 %v50_v27, %v49_v26  ;;  %v51_v29 = vld [vmem:[%s1765_s9 + $0x30] sm:$0xff]  ;;  %v52_v30 = vld [vmem:[%s1765_s9 + $0x38] sm:$0xff]  ;;  %v53_v32 = vld [vmem:[%s1765_s9 + $0x40] sm:$0xff] }
   0xa   :  { %212 = vmatpush1.bf16.msra.mxu0 %v1240_v3  ;;  %1187 = vmatpush3.bf16.msra.mxu1 %v1415_v21  ;;  %v1446_v31 = vpack.c.bf16 %v52_v30, %v51_v29  ;;  %v54_v33 = vld [vmem:[%s1765_s9 + $0x48] sm:$0xff]  ;;  %v55_v35 = vld [vmem:[%s1765_s9 + $0x50] sm:$0xff]  ;;  %v56_v36 = vld [vmem:[%s1765_s9 + $0x58] sm:$0xff] }
   0xb   :  { %213 = vmatprep.subr.bf16.mxu0 %v1287_v0  ;;  %1188 = vmatprep.subr.bf16.mxu1 %v1288_v22  ;;  %v1456_v34 = vpack.c.bf16 %v54_v33, %v53_v32  ;;  %v1466_v37 = vpack.c.bf16 %v56_v36, %v55_v35  ;;  %v57_v38 = vld [vmem:[%s1765_s9 + $0x60] sm:$0xff]  ;;  %v58_v39 = vld [vmem:[%s1765_s9 + $0x68] sm:$0xff]  ;;  %v59_v41 = vld [vmem:[%s1765_s9 + $0x70] sm:$0xff] }
   0xc   :  { %v1476_v40 = vpack.c.bf16 %v58_v39, %v57_v38  ;;  %v60_v42 = vld [vmem:[%s1765_s9 + $0x78] sm:$0xff]  ;;  %v961_v47 = vld [vmem:[%s1766_s2] ss:$0 sm:$0xff]  ;;  %v1502_v51 = vld [vmem:[%s1767_s10 + $0x8] sm:$0xff] }
   0xd   :  { %v1490_v44 = vpack.c.bf16 %v60_v42, %v59_v41  ;;  %v1509_v53 = vld [vmem:[%s1767_s10] sm:$0xff]  ;;  %v1516_v55 = vld [vmem:[%s1767_s10 + $0x10] sm:$0xff]  ;;  %v1525_v60 = vld [vmem:[%s1767_s10 + $0x18] sm:$0xff] }
   0xe   :  { %214 = vmatpush1.bf16.msra.mxu0 %v1241_v4  ;;  %1190 = vmatpush3.bf16.msra.mxu1 %v1426_v25 }
   0xf   :  { %215 = vmatprep.subr.bf16.mxu0 %v1287_v0  ;;  %1191 = vmatprep.subr.bf16.mxu1 %v1288_v22 }
  0x12   :  { %216 = vmatpush1.bf16.msra.mxu0 %v1242_v6  ;;  %1193 = vmatpush3.bf16.msra.mxu1 %v1436_v28 }
  0x13   :  { %217 = vmatprep.subr.bf16.mxu0 %v1287_v0  ;;  %1194 = vmatprep.subr.bf16.mxu1 %v1288_v22 }
  0x16   :  { %218 = vmatpush1.bf16.msra.mxu0 %v1243_v7  ;;  %1196 = vmatpush3.bf16.msra.mxu1 %v1446_v31 }
  0x17   :  { %219 = vmatprep.subr.bf16.mxu0 %v1287_v0  ;;  %1197 = vmatprep.subr.bf16.mxu1 %v1288_v22 }
  0x1a   :  { %220 = vmatpush1.bf16.msra.mxu0 %v1244_v8  ;;  %1199 = vmatpush3.bf16.msra.mxu1 %v1456_v34  ;;  %v1536_v8 = vld [vmem:[%s1767_s10 + $0x20] sm:$0xff] }
  0x1b   :  { %221 = vmatprep.subr.bf16.mxu0 %v1287_v0  ;;  %1200 = vmatprep.subr.bf16.mxu1 %v1288_v22 }
  0x1e   :  { %222 = vmatpush1.bf16.msra.mxu0 %v1245_v9  ;;  %1202 = vmatpush3.bf16.msra.mxu1 %v1466_v37 }
  0x1f   :  { %223 = vmatprep.subr.bf16.mxu0 %v1287_v0  ;;  %1203 = vmatprep.subr.bf16.mxu1 %v1288_v22 }
  0x22   :  { %224 = vmatpush1.bf16.msra.mxu0 %v1246_v10  ;;  %1205 = vmatpush3.bf16.msra.mxu1 %v1476_v40 }
  0x23   :  { %225 = vmatprep.subr.bf16.mxu0 %v1287_v0  ;;  %1206 = vmatprep.subr.bf16.mxu1 %v1288_v22 }
  0x26   :  { %226 = vmatpush1.bf16.msra.mxu0 %v1247_v11  ;;  %1208 = vmatpush3.bf16.msra.mxu1 %v1490_v44 }
  0x27   :  { %227 = vmatprep.subr.bf16.mxu0 %v1287_v0 }
  0x2a   :  { %228 = vmatpush1.bf16.msra.mxu0 %v1248_v12 }
  0x2b   :  { %229 = vmatprep.subr.bf16.mxu0 %v1287_v0 }
  0x2e   :  { %230 = vmatpush1.bf16.msra.mxu0 %v1249_v13 }
  0x2f   :  { %1122 = vmatprep.subr.bf16.mxu0 %v1290_v43 }
  0x31   :  { %240 = vmatmul.mubr.bf16.vlgmr.msra.gmra.mrb[0].mxu0 %v1250_v14  ;;  %v1543_v14 = vld [vmem:[%s1767_s10 + $0x28] sm:$0xff] }
  0x32   :  { %981 = vmatprep.mubr.msk.bf16.mxu0 %vm197_vm0, %v1253_v15 }
  0x39   :  { %248 = vmatmul.mubr.bf16.gmra.mrb[4].mxu0 %v1255_v16 }
  0x3a   :  { %982 = vmatprep.mubr.msk.bf16.mxu0 %vm197_vm0, %v1256_v17 }
  0x41   :  { %256 = vmatmul.mubr.bf16.gmra.mrb[8].mxu0 %v1258_v18 }
  0x42   :  { %1138 = vmatprep.mubr.msk.bf16.mxu0 %vm1289_vm1, %v1290_v43 }
 0x104   :  { %v241_v45 = vpop.f32.mrb[0].mxu0 }
 0x105   :  { %v243_v46 = vpop.f32.mrb[1].mxu0  ;;  %v1504_v52 = vadd.f32 %v961_v47, %v241_v45 }
 0x106   :  { %v244_v48 = vpop.f32.mrb[2].mxu0 }
 0x107   :  { %v1497_v49 = vadd.f32 %v961_v47, %v244_v48  ;;  %v246_v50 = vpop.f32.mrb[3].mxu0  ;;  %v266_v57 = vmul.f32 %v1504_v52, %v1509_v53 }
 0x109   :  { %v267_v54 = vmul.f32 %v1497_v49, %v1502_v51  ;;  %v283_v2 = vmul.f32 %v266_v57, %v266_v57 }
 0x10b   :  { %v284_v62 = vmul.f32 %v267_v54, %v267_v54  ;;  %v272_v3 = vadd.f32 %v267_v54, %v266_v57  ;;  %v1260_v57 = vld [vmem:[%s1768_s5] sm:$0xff]  }
 0x10c   :  { %v249_v56 = vpop.f32.mrb[4].mxu0 }
 0x10d   :  { %v1520_v58 = vadd.f32 %v961_v47, %v249_v56  ;;  %v251_v59 = vpop.f32.mrb[5].mxu0  ;;  %v289_v6 = vadd.f32 %v284_v62, %v283_v2  ;;  %v1259_v56 = vld [vmem:[%s1768_s5 + $0x40] sm:$0xff]   ;;  %v1263_v62 = vld [vmem:[%s1768_s5 + $0x8] sm:$0xff]   ;;  %v1266_v2 = vld [vmem:[%s1768_s5 + $0x10] sm:$0xff]  }
 0x10e   :  { %v252_v61 = vpop.f32.mrb[6].mxu0  ;;  %1025 = vmatprep.subr.bf16.mxu1 %v1259_v56  ;;  %v1261_v59 = vld [vmem:[%s1768_s5 + $0x80] sm:$0xff]  }
 0x10f   :  { %v268_v63 = vmul.f32 %v1520_v58, %v1516_v55  ;;  %v1529_v0 = vadd.f32 %v961_v47, %v252_v61  ;;  %v254_v1 = vpop.f32.mrb[7].mxu0  ;;  %1123 = vmatpush3.bf16.msra.mxu0 %v1261_v59  ;;  %v1262_v61 = vld [vmem:[%s1768_s5 + $0x48] sm:$0xff]   ;;  %v265_v59 = vld [vmem:[%s1770_s4] sm:$0x1] }
 0x110   :  { %1124 = vmatprep.subr.bf16.mxu0 %v1290_v43  ;;  %v1265_v1 = vld [vmem:[%s1768_s5 + $0x50] sm:$0xff]  }
 0x111   :  { %v285_v4 = vmul.f32 %v268_v63, %v268_v63  ;;  %v269_v5 = vmul.f32 %v1529_v0, %v1525_v60  ;;  %v273_v7 = vadd.f32 %v272_v3, %v268_v63  ;;  %v1264_v63 = vld [vmem:[%s1768_s5 + $0x88] sm:$0xff]   ;;  %v1267_v3 = vld [vmem:[%s1768_s5 + $0x90] sm:$0xff]  }
 0x113   :  { %v290_v10 = vadd.f32 %v289_v6, %v285_v4  ;;  %v286_v11 = vmul.f32 %v269_v5, %v269_v5  ;;  %v274_v16 = vadd.f32 %v273_v7, %v269_v5  ;;  %1125 = vmatpush3.bf16.msra.mxu0 %v1264_v63  ;;  %v1268_v4 = vld [vmem:[%s1768_s5 + $0x58] sm:$0xff]   ;;  %v1271_v7 = vld [vmem:[%s1768_s5 + $0x60] sm:$0xff]  }
 0x114   :  { %v257_v9 = vpop.f32.mrb[8].mxu0  ;;  %1126 = vmatprep.subr.bf16.mxu0 %v1290_v43  ;;  %v1269_v5 = vld [vmem:[%s1768_s5 + $0x18] sm:$0xff]  }
 0x115   :  { %v1538_v12 = vadd.f32 %v961_v47, %v257_v9  ;;  %v259_v13 = vpop.f32.mrb[9].mxu0  ;;  %v291_v20 = vadd.f32 %v290_v10, %v286_v11  ;;  %v1270_v6 = vld [vmem:[%s1768_s5 + $0x98] sm:$0xff]   ;;  %v1272_v9 = vld [vmem:[%s1768_s5 + $0x20] sm:$0xff]   ;;  %v1274_v11 = vld [vmem:[%s1768_s5 + $0x68] sm:$0xff]  }
 0x116   :  { %v260_v15 = vpop.f32.mrb[10].mxu0  ;;  %v1273_v10 = vld [vmem:[%s1768_s5 + $0xa0] sm:$0xff]   ;;  %v1275_v13 = vld [vmem:[%s1768_s5 + $0x28] sm:$0xff]  }
 0x117   :  { %v270_v17 = vmul.f32 %v1538_v12, %v1536_v8  ;;  %v1547_v18 = vadd.f32 %v961_v47, %v260_v15  ;;  %v262_v19 = vpop.f32.mrb[11].mxu0  ;;  %1127 = vmatpush3.bf16.msra.mxu0 %v1267_v3  ;;  %v1276_v15 = vld [vmem:[%s1768_s5 + $0xa8] sm:$0xff]  }
 0x118   :  { %1128 = vmatprep.subr.bf16.mxu0 %v1290_v43  ;;  %v1279_v19 = vld [vmem:[%s1768_s5 + $0xb0] sm:$0xff]  }
 0x119   :  { %v275_v23 = vadd.f32 %v274_v16, %v270_v17  ;;  %v287_v24 = vmul.f32 %v270_v17, %v270_v17  ;;  %v271_v26 = vmul.f32 %v1547_v18, %v1543_v14  ;;  %v1277_v16 = vld [vmem:[%s1768_s5 + $0x70] sm:$0xff]  }
 0x11a   :  { %v1278_v17 = vld [vmem:[%s1768_s5 + $0x30] sm:$0xff]  }
 0x11b   :  { %v292_v27 = vadd.f32 %v291_v20, %v287_v24  ;;  %v276_v29 = vadd.f32 %v275_v23, %v271_v26  ;;  %v288_v30 = vmul.f32 %v271_v26, %v271_v26  ;;  %1129 = vmatpush3.bf16.msra.mxu0 %v1270_v6  ;;  %v1280_v20 = vld [vmem:[%s1768_s5 + $0x78] sm:$0xff]  }
 0x11c   :  { %1130 = vmatprep.subr.bf16.mxu0 %v1290_v43  ;;  %v1281_v23 = vld [vmem:[%s1768_s5 + $0x38] sm:$0xff]  }
 0x11d   :  { %v277_v32 = vrot.slane %v276_v29, 4  ;;  %v293_v33 = vadd.f32 %v292_v27, %v288_v30  ;;  %v1282_v24 = vld [vmem:[%s1768_s5 + $0xb8] sm:$0xff]  }
 0x11f   :  { %v278_v35 = vadd.f32 %v277_v32, %v276_v29  ;;  %v294_v36 = vrot.slane %v293_v33, 4  ;;  %1131 = vmatpush3.bf16.msra.mxu0 %v1273_v10 }
 0x120   :  { %1132 = vmatprep.subr.bf16.mxu0 %v1290_v43 }
 0x121   :  { %v279_v38 = vrot.slane %v278_v35, 2  ;;  %v295_v39 = vadd.f32 %v294_v36, %v293_v33  ;;  %v1291_v36 = vmov 1966171168  }
 0x123   :  { %v280_v41 = vadd.f32 %v279_v38, %v278_v35  ;;  %v296_v42 = vrot.slane %v295_v39, 2  ;;  %1133 = vmatpush3.bf16.msra.mxu0 %v1276_v15  ;;  %v382_v38 = vunpack.c.l.s4 %v1291_v36 }
 0x124   :  { %1134 = vmatprep.subr.bf16.mxu0 %v1290_v43 }
 0x125   :  { %v281_v45 = vrot.slane %v280_v41, 1  ;;  %v297_v46 = vadd.f32 %v296_v42, %v295_v39  ;;  %v384_v39 = vlaneseq }
 0x127   :  { %v298_v47 = vrot.slane %v297_v46, 1  ;;  %v282_v48 = vadd.f32 %v281_v45, %v280_v41  ;;  %1135 = vmatpush3.bf16.msra.mxu0 %v1279_v19  ;;  %v383_v41 = vunpack.c.0.s8 %v382_v38  ;;  %v1632_v42 = vshrl.u32 %v384_v39, 7 }
 0x128   :  { %1136 = vmatprep.subr.bf16.mxu0 %v1290_v43 }
 0x129   :  { %v299_v50 = vadd.f32 %v298_v47, %v297_v46  ;;  %v1635_v45 = vsub.s32 %v383_v41, %v1632_v42  ;;  %v1643_v56 = vsub.s32 0, %v1632_v42  ;;  %vm444_vm3 = vcmp.lt.s32.totalorder %v1632_v42, 1 }
 0x12a   :  { %vm457_vm4 = vcmp.lt.s32.totalorder %v1632_v42, 7 }
 0x12b   :  { %v301_v54 = vsel %vm300_vm2, %v282_v48, %v299_v50  ;;  %1137 = vmatpush3.bf16.msra.mxu0 %v1282_v24  ;;  %v264_v50 = vld [vmem:[%s1769_s3] sm:$0x1] }
 0x12c   :  { %1120 = vmatmul.mubr.f32.vlgmr.msra.gmra.mrb[0].mxu1 %v301_v54 }
 0x12d   :  { %1026 = vmatpush3.bf16.msra.mxu1 %v1260_v57 }
 0x12e   :  { %1027 = vmatprep.subr.bf16.mxu1 %v1262_v61 }
 0x131   :  { %1028 = vmatpush3.bf16.msra.mxu1 %v1263_v62 }
 0x132   :  { %1029 = vmatprep.subr.bf16.mxu1 %v1265_v1 }
 0x135   :  { %1030 = vmatpush3.bf16.msra.mxu1 %v1266_v2 }
 0x136   :  { %1031 = vmatprep.subr.bf16.mxu1 %v1268_v4 }
 0x139   :  { %1032 = vmatpush3.bf16.msra.mxu1 %v1269_v5 }
 0x13a   :  { %1033 = vmatprep.subr.bf16.mxu1 %v1271_v7 }
 0x13d   :  { %1034 = vmatpush3.bf16.msra.mxu1 %v1272_v9 }
 0x13e   :  { %1035 = vmatprep.subr.bf16.mxu1 %v1274_v11 }
 0x141   :  { %1036 = vmatpush3.bf16.msra.mxu1 %v1275_v13 }
 0x142   :  { %1037 = vmatprep.subr.bf16.mxu1 %v1277_v16 }
 0x145   :  { %1038 = vmatpush3.bf16.msra.mxu1 %v1278_v17 }
 0x146   :  { %1039 = vmatprep.subr.bf16.mxu1 %v1280_v20 }
 0x149   :  { %1040 = vmatpush3.bf16.msra.mxu1 %v1281_v23 }
 0x14a   :  { %1209 = vmatprep.subr.bf16.mxu1 %v1288_v22 }
 0x1ff   :  { %v368_v26 = vpop.f32.mrb[0].mxu1 }
 0x200   :  { %v372_v27 = vmul.f32 0.001953125, %v368_v26  ;;  %v1121_v29 = vpop.f32.mrb[1].mxu1 }
 0x202   :  { %v373_v30 = vmul.f32 %v372_v27, %v372_v27 }
 0x204   :  { %v375_v32 = vrot.slane %v373_v30, 7 }
 0x206   :  { %v377_v33 = vsub.f32 %v372_v27, %v375_v32 }
 0x208   :  { %v378_v35 = vadd.f32 1e-05, %v377_v33 }
 0x20a   :  { %1283 = vrsqrt.f32 %v378_v35 }
 0x214   :  { %v1284_v46 = vpop.eup %1283 }
 0x215   :  { %v387_v47 = vrot.slane %v1284_v46, %v1635_v45 }
 0x217   :  { %v388_v48 = vcombine.high %v387_v47, %v387_v47 }
 0x219   :  { %v395_v54 = vrot.slane %v388_v48, %v1635_v45 }
 0x21b   :  { %v397_v57 = vmul.f32 %v395_v54, %v264_v50 }
 0x21d   :  { %v398_v61 = vmul.f32 %v397_v57, %v372_v27  ;;  %v404_v62 = vrot.slane %v397_v57, %v1643_v56 }
 0x21f   :  { %v399_v63 = vsub.f32 %v265_v59, %v398_v61  ;;  %v406_v1 = vmul.f32 %v404_v62, %v1504_v52  ;;  %v407_v3 = vmul.f32 %v404_v62, %v1497_v49  ;;  %v411_v4 = vmul.f32 %v404_v62, %v1547_v18 }
 0x220   :  { %v408_v5 = vmul.f32 %v404_v62, %v1520_v58  ;;  %v409_v6 = vmul.f32 %v404_v62, %v1529_v0  ;;  %v410_v7 = vmul.f32 %v404_v62, %v1538_v12 }
 0x221   :  { %v416_v2 = vrot.slane %v399_v63, %v1643_v56 }
 0x223   :  { %v418_v9 = vadd.f32 %v416_v2, %v406_v1  ;;  %v419_v10 = vadd.f32 %v416_v2, %v407_v3  ;;  %v423_v11 = vadd.f32 %v416_v2, %v411_v4  ;;  %v420_v13 = vadd.f32 %v416_v2, %v408_v5 }
 0x224   :  { %v421_v15 = vadd.f32 %v416_v2, %v409_v6  ;;  %v422_v16 = vadd.f32 %v416_v2, %v410_v7 }
 0x225   :  { %v424_v17 = vmax.f32 %v418_v9, 0.0  ;;  %v425_v52 = vmax.f32 %v419_v10, 0.0  ;;  %v429_v19 = vmax.f32 %v423_v11, 0.0  ;;  %v426_v20 = vmax.f32 %v420_v13, 0.0 }
 0x226   :  { %v427_v23 = vmax.f32 %v421_v15, 0.0  ;;  %v428_v49 = vmax.f32 %v422_v16, 0.0 }
 0x227   :  { %v430_v18 = vmul.f32 %v424_v17, %v1509_v53  ;;  %v431_v58 = vmul.f32 %v425_v52, %v1502_v51  ;;  %v435_v0 = vmul.f32 %v429_v19, %v1543_v14  ;;  %v432_v12 = vmul.f32 %v426_v20, %v1516_v55 }
 0x228   :  { %v433_v24 = vmul.f32 %v427_v23, %v1525_v60  ;;  %v434_v36 = vmul.f32 %v428_v49, %v1536_v8 }
 0x229   :  { %v451_v26 = vrot.slane %v430_v18, 1  ;;  %v452_v27 = vrot.slane %v431_v58, 1  ;;  %v465_v29 = vpack.c.bf16 %v431_v58, %v430_v18  ;;  %v436_v30 = vrot.slane %v430_v18, 7 }
 0x22a   :  { %v437_v32 = vrot.slane %v431_v58, 7  ;;  %v441_v33 = vrot.slane %v435_v0, 7  ;;  %v453_v35 = vrot.slane %v432_v12, 1  ;;  %v468_v50 = vpack.c.bf16 %v433_v24, %v432_v12 }
 0x22b   :  { %704 = vmatprep.mubr.bf16.mxu1 %v465_v29  ;;  %v462_v38 = vsel %vm457_vm4, %v451_v26, %v452_v27  ;;  %v438_v54 = vrot.slane %v432_v12, 7  ;;  %v439_v57 = vrot.slane %v433_v24, 7  ;;  %v454_v59 = vrot.slane %v433_v24, 1 }
 0x22c   :  { %v449_v39 = vsel %vm444_vm3, %v436_v30, %v437_v32  ;;  %v450_v41 = vsel %vm444_vm3, %v441_v33, %v436_v30  ;;  %v461_v46 = vsel %vm457_vm4, %v452_v27, %v453_v35  ;;  %v455_v61 = vrot.slane %v434_v36, 1 }
 0x22d   :  { %v464_v47 = vpack.c.bf16 %v449_v39, %v450_v41  ;;  %v466_v48 = vpack.c.bf16 %v461_v46, %v462_v38  ;;  %v447_v62 = vsel %vm444_vm3, %v438_v54, %v439_v57  ;;  %v448_v63 = vsel %vm444_vm3, %v437_v32, %v438_v54 }
 0x22e   :  { %v459_v1 = vsel %vm457_vm4, %v454_v59, %v455_v61  ;;  %v460_v2 = vsel %vm457_vm4, %v453_v35, %v454_v59  ;;  %v467_v3 = vpack.c.bf16 %v447_v62, %v448_v63  ;;  %v471_v5 = vpack.c.bf16 %v435_v0, %v434_v36 }
 0x22f   :  { %705 = vmatmul.mubr.bf16.vlgmr.msra.gmra.mrb[4].mxu1 %v464_v47  ;;  %1139 = vmatmul.mubr.bf16.vlgmr.msra.gmra.mrb[12].mxu0 %v466_v48  ;;  %v469_v4 = vpack.c.bf16 %v459_v1, %v460_v2  ;;  %v456_v6 = vrot.slane %v435_v0, 1 }
 0x230   :  { %712 = vmatprep.mubr.bf16.mxu1 %v468_v50  ;;  %1142 = vmatprep.mubr.msk.bf16.mxu0 %vm1289_vm1, %v1290_v43 }
 0x231   :  { %1211 = vmatpush3.bf16.msra.mxu1 %v1415_v21  ;;  %v440_v21 = vrot.slane %v434_v36, 7  ;;  %v463_v10 = vsel %vm457_vm4, %v456_v6, %v451_v26 }
 0x232   :  { %1212 = vmatprep.subr.bf16.mxu1 %v1288_v22 }
 0x233   :  { %v445_v7 = vsel %vm444_vm3, %v440_v21, %v441_v33  ;;  %v446_v9 = vsel %vm444_vm3, %v439_v57, %v440_v21 }
 0x234   :  { %v470_v11 = vpack.c.bf16 %v445_v7, %v446_v9 }
 0x235   :  { %1214 = vmatpush3.bf16.msra.mxu1 %v1426_v25  ;;  %v458_v25 = vsel %vm457_vm4, %v455_v61, %v456_v6 }
 0x236   :  { %1215 = vmatprep.subr.bf16.mxu1 %v1288_v22  ;;  %v472_v13 = vpack.c.bf16 %v463_v10, %v458_v25 }
 0x237   :  { %713 = vmatmul.mubr.bf16.gmra.mrb[8].mxu1 %v467_v3  ;;  %1143 = vmatmul.mubr.bf16.gmra.mrb[16].mxu0 %v469_v4 }
 0x238   :  { %720 = vmatprep.mubr.bf16.mxu1 %v471_v5  ;;  %1146 = vmatprep.mubr.msk.bf16.mxu0 %vm1289_vm1, %v1290_v43 }
 0x239   :  { %1217 = vmatpush3.bf16.msra.mxu1 %v1436_v28 }
 0x23a   :  { %1218 = vmatprep.subr.bf16.mxu1 %v1288_v22 }
 0x23d   :  { %1220 = vmatpush3.bf16.msra.mxu1 %v1446_v31 }
 0x23e   :  { %1221 = vmatprep.subr.bf16.mxu1 %v1288_v22 }
 0x23f   :  { %721 = vmatmul.mubr.bf16.gmra.mrb[12].mxu1 %v470_v11  ;;  %1147 = vmatmul.mubr.bf16.gmra.mrb[20].mxu0 %v472_v13 }
 0x240   :  { %1182 = vmatprep.mubr.msk.f32.mxu1 %vm1289_vm1, %v1290_v43  ;;  %v983_v43 = vld [vmem:[%s1771_s6] ss:$0 sm:$0xff] }
 0x241   :  { %1223 = vmatpush3.bf16.msra.mxu1 %v1456_v34 }
 0x242   :  { %1224 = vmatprep.subr.bf16.mxu1 %v1288_v22 }
 0x245   :  { %1226 = vmatpush3.bf16.msra.mxu1 %v1466_v37 }
 0x246   :  { %1227 = vmatprep.subr.bf16.mxu1 %v1288_v22 }
 0x249   :  { %1229 = vmatpush3.bf16.msra.mxu1 %v1476_v40 }
 0x24a   :  { %1230 = vmatprep.subr.bf16.mxu1 %v1288_v22 }
 0x24d   :  { %1232 = vmatpush3.bf16.msra.mxu1 %v1490_v44 }
 0x302   :  { %v1041_v28 = vpop.f32.mrb[4].mxu1  ;;  %v763_v31 = vpop.f32.mrb[12].mxu0 }
 0x303   :  { %v1042_v42 = vpop.f32.mrb[5].mxu1  ;;  %v1140_v34 = vpop.f32.mrb[13].mxu0 }
 0x304   :  { %v1043_v15 = vadd.f32 %v1042_v42, %v1041_v28  ;;  %v1044_v16 = vpop.f32.mrb[6].mxu1  ;;  %v766_v17 = vpop.f32.mrb[14].mxu0 }
 0x305   :  { %v1045_v37 = vpop.f32.mrb[7].mxu1  ;;  %v1141_v52 = vpop.f32.mrb[15].mxu0 }
 0x306   :  { %v707_v19 = vadd.f32 %v1043_v15, %v983_v43  ;;  %v1046_v20 = vadd.f32 %v1045_v37, %v1044_v16 }
 0x308   :  { %v1712_v40 = vadd.f32 %v763_v31, %v707_v19  ;;  %v710_v22 = vadd.f32 %v1046_v20, %v983_v43 }
 0x30a   :  { %v1714_v23 = vadd.f32 %v766_v17, %v710_v22  ;;  %v1047_v44 = vpop.f32.mrb[8].mxu1  ;;  %v771_v49 = vpop.f32.mrb[16].mxu0  ;;  %v788_v33 = vmul.f32 %v1712_v40, %v1509_v53 }
 0x30b   :  { %v1048_v18 = vpop.f32.mrb[9].mxu1  ;;  %v1144_v58 = vpop.f32.mrb[17].mxu0 }
 0x30c   :  { %v1049_v0 = vadd.f32 %v1048_v18, %v1047_v44  ;;  %v1050_v12 = vpop.f32.mrb[10].mxu1  ;;  %v774_v24 = vpop.f32.mrb[18].mxu0  ;;  %v789_v29 = vmul.f32 %v1714_v23, %v1502_v51  ;;  %v805_v48 = vmul.f32 %v788_v33, %v788_v33 }
 0x30d   :  { %v1051_v26 = vpop.f32.mrb[11].mxu1  ;;  %v1145_v27 = vpop.f32.mrb[19].mxu0 }
 0x30e   :  { %v715_v30 = vadd.f32 %v1049_v0, %v983_v43  ;;  %v1052_v32 = vadd.f32 %v1051_v26, %v1050_v12  ;;  %v806_v38 = vmul.f32 %v789_v29, %v789_v29  ;;  %v794_v51 = vadd.f32 %v789_v29, %v788_v33 }
 0x310   :  { %v1720_v35 = vadd.f32 %v771_v49, %v715_v30  ;;  %v718_v36 = vadd.f32 %v1052_v32, %v983_v43  ;;  %v811_v2 = vadd.f32 %v806_v38, %v805_v48 }
 0x312   :  { %v790_v39 = vmul.f32 %v1720_v35, %v1516_v55  ;;  %v1724_v41 = vadd.f32 %v774_v24, %v718_v36  ;;  %v1053_v46 = vpop.f32.mrb[12].mxu1  ;;  %v779_v47 = vpop.f32.mrb[20].mxu0  ;;  %v786_v36 = vld [vmem:[%s1772_s7] sm:$0x1] }
 0x313   :  { %v1054_v50 = vpop.f32.mrb[13].mxu1  ;;  %v1148_v54 = vpop.f32.mrb[21].mxu0 }
 0x314   :  { %v807_v57 = vmul.f32 %v790_v39, %v790_v39  ;;  %v791_v59 = vmul.f32 %v1724_v41, %v1525_v60  ;;  %v1055_v53 = vadd.f32 %v1054_v50, %v1053_v46  ;;  %v1056_v61 = vpop.f32.mrb[14].mxu1  ;;  %v782_v62 = vpop.f32.mrb[22].mxu0  ;;  %v795_v3 = vadd.f32 %v794_v51, %v790_v39  ;;  %v787_v46 = vld [vmem:[%s1773_s8] sm:$0x1] }
 0x315   :  { %v1057_v63 = vpop.f32.mrb[15].mxu1  ;;  %v1149_v1 = vpop.f32.mrb[23].mxu0 }
 0x316   :  { %v723_v55 = vadd.f32 %v1055_v53, %v983_v43  ;;  %v1058_v4 = vadd.f32 %v1057_v63, %v1056_v61  ;;  %v812_v5 = vadd.f32 %v811_v2, %v807_v57  ;;  %v808_v21 = vmul.f32 %v791_v59, %v791_v59 }
 0x317   :  { %v796_v9 = vadd.f32 %v795_v3, %v791_v59 }
 0x318   :  { %v780_v6 = vadd.f32 %v779_v47, %v723_v55  ;;  %v726_v7 = vadd.f32 %v1058_v4, %v983_v43  ;;  %v813_v11 = vadd.f32 %v812_v5, %v808_v21 }
 0x31a   :  { %v792_v25 = vmul.f32 %v780_v6, %v1536_v8  ;;  %v783_v10 = vadd.f32 %v782_v62, %v726_v7 }
 0x31c   :  { %v797_v13 = vadd.f32 %v796_v9, %v792_v25  ;;  %v809_v60 = vmul.f32 %v792_v25, %v792_v25  ;;  %v793_v28 = vmul.f32 %v783_v10, %v1543_v14 }
 0x31e   :  { %v814_v31 = vadd.f32 %v813_v11, %v809_v60  ;;  %v798_v42 = vadd.f32 %v797_v13, %v793_v28  ;;  %v810_v34 = vmul.f32 %v793_v28, %v793_v28 }
 0x320   :  { %v799_v15 = vrot.slane %v798_v42, 4  ;;  %v815_v16 = vadd.f32 %v814_v31, %v810_v34 }
 0x322   :  { %v800_v17 = vadd.f32 %v799_v15, %v798_v42  ;;  %v816_v37 = vrot.slane %v815_v16, 4 }
 0x324   :  { %v801_v52 = vrot.slane %v800_v17, 2  ;;  %v817_v19 = vadd.f32 %v816_v37, %v815_v16 }
 0x326   :  { %v802_v20 = vadd.f32 %v801_v52, %v800_v17  ;;  %v818_v43 = vrot.slane %v817_v19, 2 }
 0x328   :  { %v803_v22 = vrot.slane %v802_v20, 1  ;;  %v819_v44 = vadd.f32 %v818_v43, %v817_v19 }
 0x32a   :  { %v820_v8 = vrot.slane %v819_v44, 1  ;;  %v804_v49 = vadd.f32 %v803_v22, %v802_v20 }
 0x32c   :  { %v821_v18 = vadd.f32 %v820_v8, %v819_v44 }
 0x32e   :  { %v822_v58 = vsel %vm300_vm2, %v804_v49, %v821_v18 }
 0x32f   :  { %1183 = vmatmul.mubr.f32.vlgmr.msra.gmra.mrb[2].mxu1 %v822_v58 }
 0x402   :  { %v889_v14 = vpop.f32.mrb[2].mxu1 }
 0x403   :  { %v893_v0 = vmul.f32 0.001953125, %v889_v14  ;;  %v1184_v12 = vpop.f32.mrb[3].mxu1 }
 0x405   :  { %v894_v24 = vmul.f32 %v893_v0, %v893_v0 }
 0x407   :  { %v896_v26 = vrot.slane %v894_v24, 7 }
 0x409   :  { %v898_v27 = vsub.f32 %v893_v0, %v896_v26 }
 0x40b   :  { %v899_v29 = vadd.f32 1e-05, %v898_v27 }
 0x40d   :  { %1285 = vrsqrt.f32 %v899_v29 }
 0x417   :  { %v1286_v30 = vpop.eup %1285 }
 0x418   :  { %v908_v32 = vrot.slane %v1286_v30, %v1635_v45 }
 0x41a   :  { %v909_v33 = vcombine.high %v908_v32, %v908_v32 }
 0x41c   :  { %v916_v38 = vrot.slane %v909_v33, %v1635_v45 }
 0x41e   :  { %v918_v39 = vmul.f32 %v916_v38, %v786_v36 }
 0x420   :  { %v919_v47 = vmul.f32 %v918_v39, %v893_v0  ;;  %v925_v48 = vrot.slane %v918_v39, %v1643_v56 }
 0x422   :  { %v920_v50 = vsub.f32 %v787_v46, %v919_v47  ;;  %v927_v54 = vmul.f32 %v925_v48, %v1712_v40  ;;  %v928_v51 = vmul.f32 %v925_v48, %v1714_v23  ;;  %v929_v57 = vmul.f32 %v925_v48, %v1720_v35 }
 0x423   :  { %v930_v59 = vmul.f32 %v925_v48, %v1724_v41  ;;  %v931_v45 = vmul.f32 %v925_v48, %v780_v6  ;;  %v932_v61 = vmul.f32 %v925_v48, %v783_v10 }
 0x424   :  { %v937_v53 = vrot.slane %v920_v50, %v1643_v56 }
 0x426   :  { %v939_v62 = vadd.f32 %v937_v53, %v927_v54  ;;  %v940_v63 = vadd.f32 %v937_v53, %v928_v51  ;;  %v941_v1 = vadd.f32 %v937_v53, %v929_v57  ;;  %v942_v2 = vadd.f32 %v937_v53, %v930_v59 }
 0x427   :  { %v943_v3 = vadd.f32 %v937_v53, %v931_v45  ;;  %v944_v55 = vadd.f32 %v937_v53, %v932_v61 }
 0x428   :  { %v945_v4 = vmax.f32 %v939_v62, 0.0  ;;  %v946_v5 = vmax.f32 %v940_v63, 0.0  ;;  %v947_v21 = vmax.f32 %v941_v1, 0.0  ;;  %v948_v40 = vmax.f32 %v942_v2, 0.0 }
 0x429   :  { %v949_v7 = vmax.f32 %v943_v3, 0.0  ;;  %v950_v23 = vmax.f32 %v944_v55, 0.0 }
 0x42a   :  { %951 = vst [vmem:[%s1774_s11] sm:$0xff] %v945_v4  ;;  %952 = vst [vmem:[%s1774_s11 + $0x8] sm:$0xff] %v946_v5 }
 0x42b   :  { %953 = vst [vmem:[%s1774_s11 + $0x10] sm:$0xff] %v947_v21  ;;  %954 = vst [vmem:[%s1774_s11 + $0x18] sm:$0xff] %v948_v40 }
 0x42c   :  { %955 = vst [vmem:[%s1774_s11 + $0x20] sm:$0xff] %v949_v7  ;;  %956 = vst [vmem:[%s1774_s11 + $0x28] sm:$0xff] %v950_v23 }

</bundles_post_ra>
